<compile_context>
chip_gen: v6e
topology: v6e:2x2x1
jax: 0.10.0
libtpu: 0.0.40
codegen_flags: <defaults>
</compile_context>

<pallas_src>
import functools

import jax
import jax.numpy as jnp
from jax import lax
from jax.experimental import pallas as pl
from jax.experimental.pallas import tpu as pltpu


_MASK_THRESH = 0.9999  # robust version of the module's `(mask >= 1.0)`


def _round_up(v, m):
    return (v + m - 1) // m * m


def _warp_kernel(x_ref, flow_ref, base_ref, out_ref, *, H, W, C):
    # x_ref:    (1, C*H, W)  source image, channels padded to a multiple of 8
    # flow_ref: (1, 2, T)    flow (u, v) in pixels for this output-pixel tile
    # base_ref: (2, T)       normalized base sampling grid (get_grid) for tile
    # out_ref:  (1, C, T)    warped * mask
    f32 = jnp.float32
    T = out_ref.shape[-1]

    sx = 2.0 / float(max(W - 1, 1))
    sy = 2.0 / float(max(H - 1, 1))

    bg = base_ref[...]              # (2, T)
    fl = flow_ref[0]                # (2, T)
    gx = bg[0:1, :] + fl[0:1, :] * sx
    gy = bg[1:2, :] + fl[1:2, :] * sy

    # unnormalize to pixel coordinates (align_corners=False)
    ix = ((gx + 1.0) * W - 1.0) * 0.5   # (1, T)
    iy = ((gy + 1.0) * H - 1.0) * 0.5   # (1, T)

    # Separable bilinear hat weights against every input column / row.
    # Out-of-range sample positions get zero weight -> padding_mode='zeros'.
    cols = lax.broadcasted_iota(jnp.int32, (W, T), 0).astype(f32)
    rows = lax.broadcasted_iota(jnp.int32, (H, T), 0).astype(f32)
    wx = jnp.maximum(1.0 - jnp.abs(ix - cols), 0.0)     # (W, T)
    wy = jnp.maximum(1.0 - jnp.abs(iy - rows), 0.0)     # (H, T)

    # Horizontal interpolation on the MXU: (C*H, W) @ (W, T) -> (C*H, T).
    g = jnp.dot(x_ref[0], wx, preferred_element_type=f32)

    # Vertical interpolation: weighted reduction over the H row-samples.
    warped = jnp.sum(g.reshape(C, H, T) * wy[None, :, :], axis=1)   # (C, T)

    # Validity mask == grid_sample(ones, grid) thresholded.  Because the
    # bilinear weights factor, the sum of in-bounds corner weights is exactly
    # (sum_s wx[s]) * (sum_r wy[r]).
    mask_val = (jnp.sum(wx, axis=0, keepdims=True) *
                jnp.sum(wy, axis=0, keepdims=True))                  # (1, T)
    mask = (mask_val >= _MASK_THRESH).astype(f32)

    out_ref[0] = warped * mask


def warping_layer_flow(x, flow, *, tile_n=256):
    """x: (B, C, H, W) f32, flow: (B, 2, H, W) f32 -> (B, C, H, W) f32."""
    B, C, H, W = x.shape
    HW = H * W
    x = x.astype(jnp.float32)
    flow = flow.astype(jnp.float32)

    # Pad channels to sublane granularity and the spatial axis to lane-dense
    # multiples of the output tile.
    C_pad = _round_up(max(C, 1), 8)
    tile_n = max(128, (int(tile_n) // 128) * 128)
    tile_n = min(tile_n, _round_up(HW, 128))
    HW_pad = _round_up(HW, tile_n)
    n_tiles = HW_pad // tile_n

    # Source image: (B, C_pad*H, W) so the horizontal-interp matmul LHS has
    # M = C_pad*H rows (good MXU row occupancy even for tiny C).
    x_p = jnp.pad(x, ((0, 0), (0, C_pad - C), (0, 0), (0, 0)))
    x2d = x_p.reshape(B, C_pad * H, W)

    # Flow flattened so its last axis is lane-dense and tiles with the output.
    flow_flat = flow.reshape(B, 2, HW)
    flow_flat = jnp.pad(flow_flat, ((0, 0), (0, 0), (0, HW_pad - HW)))

    # Static normalized base grid (get_grid), flattened + padded like output.
    col = jnp.arange(W, dtype=jnp.float32)
    row = jnp.arange(H, dtype=jnp.float32)
    base_x = jnp.broadcast_to(
        (-1.0 + 2.0 * col / float(max(W - 1, 1)))[None, :], (H, W))
    base_y = jnp.broadcast_to(
        (-1.0 + 2.0 * row / float(max(H - 1, 1)))[:, None], (H, W))
    base = jnp.stack([base_x.reshape(HW), base_y.reshape(HW)], axis=0)
    base = jnp.pad(base, ((0, 0), (0, HW_pad - HW)))

    kernel = functools.partial(_warp_kernel, H=H, W=W, C=C_pad)

    out = pl.pallas_call(
        kernel,
        out_shape=jax.ShapeDtypeStruct((B, C_pad, HW_pad), jnp.float32),
        grid_spec=pltpu.PrefetchScalarGridSpec(
            num_scalar_prefetch=0,
            grid=(B, n_tiles),
            in_specs=[
                # image block ignores the tile axis -> stays VMEM-resident
                pl.BlockSpec((1, C_pad * H, W), lambda b, n: (b, 0, 0)),
                pl.BlockSpec((1, 2, tile_n), lambda b, n: (b, 0, n)),
                pl.BlockSpec((2, tile_n), lambda b, n: (0, n)),
            ],
            out_specs=pl.BlockSpec((1, C_pad, tile_n), lambda b, n: (b, 0, n)),
        ),
        compiler_params=pltpu.CompilerParams(
            dimension_semantics=("parallel", "parallel"),
            vmem_limit_bytes=32 * 1024 * 1024,
        ),
    )(x2d, flow_flat, base)

    return out[:, :C, :HW].reshape(B, C, H, W)


def _reference_warp(x, flow):
    """Pure-JAX reference (bilinear, zeros padding, align_corners=False)."""
    B, C, H, W = x.shape
    col = jnp.arange(W, dtype=jnp.float32)
    row = jnp.arange(H, dtype=jnp.float32)
    base_x = (-1.0 + 2.0 * col / float(max(W - 1, 1)))[None, None, :]
    base_y = (-1.0 + 2.0 * row / float(max(H - 1, 1)))[None, :, None]
    gx = base_x + flow[:, 0] * (2.0 / float(max(W - 1, 1)))
    gy = base_y + flow[:, 1] * (2.0 / float(max(H - 1, 1)))
    ix = ((gx + 1.0) * W - 1.0) * 0.5
    iy = ((gy + 1.0) * H - 1.0) * 0.5
    x0 = jnp.floor(ix)
    y0 = jnp.floor(iy)
    out = jnp.zeros((B, C, H, W), jnp.float32)
    for dx, dy in ((0, 0), (1, 0), (0, 1), (1, 1)):
        xc = x0 + dx
        yc = y0 + dy
        w = (1.0 - jnp.abs(ix - xc)) * (1.0 - jnp.abs(iy - yc))
        valid = (xc >= 0) & (xc <= W - 1) & (yc >= 0) & (yc <= H - 1)
        xi = jnp.clip(xc, 0, W - 1).astype(jnp.int32)
        yi = jnp.clip(yc, 0, H - 1).astype(jnp.int32)
        g = jnp.take_along_axis(
            x.reshape(B, C, H * W),
            (yi * W + xi).reshape(B, 1, H * W),
            axis=2,
        ).reshape(B, C, H, W)
        out = out + g * jnp.where(valid, w, 0.0)[:, None]
    # mask = grid_sample(ones) thresholded, computed with the same separable
    # in-bounds weight sums used by the kernel.
    wx_all = jnp.maximum(1.0 - jnp.abs(ix[..., None] - col), 0.0)   # (B,H,W,W)
    wy_all = jnp.maximum(1.0 - jnp.abs(iy[..., None] - row), 0.0)   # (B,H,W,H)
    mask = ((wx_all.sum(-1) * wy_all.sum(-1)) >= _MASK_THRESH)
    return out * mask[:, None].astype(jnp.float32)


if __name__ == "__main__":
    key = jax.random.PRNGKey(0)
    kx, kf = jax.random.split(key)
    B, C, H, W = 2, 4, 16, 16
    x = jax.random.normal(kx, (B, C, H, W), dtype=jnp.float32)
    # flow in pixel units; moderate magnitude so some samples land out of bounds
    flow = 3.0 * jax.random.normal(kf, (B, 2, H, W), dtype=jnp.float32)

    # tile_n=128 -> 2 output-pixel tiles per batch, so the tiled path is exercised.
    out = warping_layer_flow(x, flow, tile_n=128)
    out = jax.block_until_ready(out)

    ref = _reference_warp(x, flow)
    assert out.shape == (B, C, H, W)
    max_err = float(jnp.max(jnp.abs(out - ref)))
    assert jnp.allclose(out, ref, atol=1e-5, rtol=1e-5), f"mismatch vs reference: {max_err}"

    print("KERNEL_OK")
</pallas_src>

<mosaic_0001>
module attributes {stable_mosaic.version = 11 : i64} {
  func.func @_warp_kernel(%arg0: i32, %arg1: i32, %arg2: memref<1x128x16xf32, #tpu.memory_space<vmem>>, %arg3: memref<1x2x128xf32, #tpu.memory_space<vmem>>, %arg4: memref<2x128xf32, #tpu.memory_space<vmem>>, %arg5: memref<1x8x128xf32, #tpu.memory_space<vmem>>) attributes {dimension_semantics = [#tpu.dimension_semantics<parallel>, #tpu.dimension_semantics<parallel>], iteration_bounds = array<i64: 2, 2>, scalar_prefetch = 0 : i64, scratch_operands = 0 : i64, tpu.core_type = #tpu.core_type<tc>, window_params = [{transform_indices = @transform_0, window_bounds = array<i64: 1, 128, 16>}, {transform_indices = @transform_1, window_bounds = array<i64: 1, 2, 128>}, {transform_indices = @transform_2, window_bounds = array<i64: 2, 128>}, {transform_indices = @transform_3, window_bounds = array<i64: 1, 8, 128>}]} {
    %c0 = arith.constant 0 : index
    %c0_0 = arith.constant 0 : index
    %0 = vector.load %arg4[%c0, %c0_0] : memref<2x128xf32, #tpu.memory_space<vmem>>, vector<2x128xf32>
    %c0_1 = arith.constant 0 : index
    %c0_2 = arith.constant 0 : index
    %c0_3 = arith.constant 0 : index
    %1 = vector.load %arg3[%c0_1, %c0_2, %c0_3] : memref<1x2x128xf32, #tpu.memory_space<vmem>>, vector<1x2x128xf32>
    %2 = vector.shape_cast %1 : vector<1x2x128xf32> to vector<2x128xf32>
    %3 = vector.extract_strided_slice %0 {offsets = [0, 0], sizes = [1, 128], strides = [1, 1]} : vector<2x128xf32> to vector<1x128xf32>
    %4 = vector.extract_strided_slice %2 {offsets = [0, 0], sizes = [1, 128], strides = [1, 1]} : vector<2x128xf32> to vector<1x128xf32>
    %cst = arith.constant 0.13333334 : f32
    %5 = vector.broadcast %cst : f32 to vector<1x128xf32>
    %6 = arith.mulf %4, %5 : vector<1x128xf32>
    %7 = arith.addf %3, %6 : vector<1x128xf32>
    %8 = vector.extract_strided_slice %0 {offsets = [1, 0], sizes = [1, 128], strides = [1, 1]} : vector<2x128xf32> to vector<1x128xf32>
    %9 = vector.extract_strided_slice %2 {offsets = [1, 0], sizes = [1, 128], strides = [1, 1]} : vector<2x128xf32> to vector<1x128xf32>
    %cst_4 = arith.constant 0.13333334 : f32
    %10 = vector.broadcast %cst_4 : f32 to vector<1x128xf32>
    %11 = arith.mulf %9, %10 : vector<1x128xf32>
    %12 = arith.addf %8, %11 : vector<1x128xf32>
    %cst_5 = arith.constant 1.000000e+00 : f32
    %13 = vector.broadcast %cst_5 : f32 to vector<1x128xf32>
    %14 = arith.addf %7, %13 : vector<1x128xf32>
    %cst_6 = arith.constant 1.600000e+01 : f32
    %15 = vector.broadcast %cst_6 : f32 to vector<1x128xf32>
    %16 = arith.mulf %14, %15 : vector<1x128xf32>
    %cst_7 = arith.constant 1.000000e+00 : f32
    %17 = vector.broadcast %cst_7 : f32 to vector<1x128xf32>
    %18 = arith.subf %16, %17 : vector<1x128xf32>
    %cst_8 = arith.constant 5.000000e-01 : f32
    %19 = vector.broadcast %cst_8 : f32 to vector<1x128xf32>
    %20 = arith.mulf %18, %19 : vector<1x128xf32>
    %cst_9 = arith.constant 1.000000e+00 : f32
    %21 = vector.broadcast %cst_9 : f32 to vector<1x128xf32>
    %22 = arith.addf %12, %21 : vector<1x128xf32>
    %cst_10 = arith.constant 1.600000e+01 : f32
    %23 = vector.broadcast %cst_10 : f32 to vector<1x128xf32>
    %24 = arith.mulf %22, %23 : vector<1x128xf32>
    %cst_11 = arith.constant 1.000000e+00 : f32
    %25 = vector.broadcast %cst_11 : f32 to vector<1x128xf32>
    %26 = arith.subf %24, %25 : vector<1x128xf32>
    %cst_12 = arith.constant 5.000000e-01 : f32
    %27 = vector.broadcast %cst_12 : f32 to vector<1x128xf32>
    %28 = arith.mulf %26, %27 : vector<1x128xf32>
    %29 = tpu.iota {dimensions = array<i32: 0>} : vector<16x128xi32>
    %30 = arith.sitofp %29 : vector<16x128xi32> to vector<16x128xf32>
    %31 = tpu.iota {dimensions = array<i32: 0>} : vector<16x128xi32>
    %32 = arith.sitofp %31 : vector<16x128xi32> to vector<16x128xf32>
    %33 = vector.broadcast %20 : vector<1x128xf32> to vector<16x128xf32>
    %34 = arith.subf %33, %30 : vector<16x128xf32>
    %35 = math.absf %34 : vector<16x128xf32>
    %cst_13 = arith.constant 1.000000e+00 : f32
    %36 = vector.broadcast %cst_13 : f32 to vector<16x128xf32>
    %37 = arith.subf %36, %35 : vector<16x128xf32>
    %cst_14 = arith.constant 0.000000e+00 : f32
    %38 = vector.broadcast %cst_14 : f32 to vector<16x128xf32>
    %39 = arith.maximumf %37, %38 : vector<16x128xf32>
    %40 = vector.broadcast %28 : vector<1x128xf32> to vector<16x128xf32>
    %41 = arith.subf %40, %32 : vector<16x128xf32>
    %42 = math.absf %41 : vector<16x128xf32>
    %cst_15 = arith.constant 1.000000e+00 : f32
    %43 = vector.broadcast %cst_15 : f32 to vector<16x128xf32>
    %44 = arith.subf %43, %42 : vector<16x128xf32>
    %cst_16 = arith.constant 0.000000e+00 : f32
    %45 = vector.broadcast %cst_16 : f32 to vector<16x128xf32>
    %46 = arith.maximumf %44, %45 : vector<16x128xf32>
    %c0_17 = arith.constant 0 : index
    %c0_18 = arith.constant 0 : index
    %c0_19 = arith.constant 0 : index
    %47 = vector.load %arg2[%c0_17, %c0_18, %c0_19] : memref<1x128x16xf32, #tpu.memory_space<vmem>>, vector<1x128x16xf32>
    %48 = vector.shape_cast %47 : vector<1x128x16xf32> to vector<128x16xf32>
    %cst_20 = arith.constant dense<0.000000e+00> : vector<128x128xf32>
    %49 = tpu.matmul %48, %39, %cst_20 {dimension_numbers = #tpu.dot_dimension_numbers<[1], [0], [0], [1], [0, 0, 1, 1], [], []>} : vector<128x16xf32>, vector<16x128xf32>, vector<128x128xf32> -> vector<128x128xf32>
    %50 = vector.shape_cast %49 : vector<128x128xf32> to vector<8x16x128xf32>
    %51 = vector.shape_cast %46 : vector<16x128xf32> to vector<1x16x128xf32>
    %52 = vector.broadcast %51 : vector<1x16x128xf32> to vector<8x16x128xf32>
    %53 = arith.mulf %50, %52 : vector<8x16x128xf32>
    %cst_21 = arith.constant dense<0.000000e+00> : vector<8x128xf32>
    %54 = vector.multi_reduction <add>, %53, %cst_21 [1] : vector<8x16x128xf32> to vector<8x128xf32>
    %cst_22 = arith.constant dense<0.000000e+00> : vector<128xf32>
    %55 = vector.multi_reduction <add>, %39, %cst_22 [0] : vector<16x128xf32> to vector<128xf32>
    %56 = vector.shape_cast %55 : vector<128xf32> to vector<1x128xf32>
    %cst_23 = arith.constant dense<0.000000e+00> : vector<128xf32>
    %57 = vector.multi_reduction <add>, %46, %cst_23 [0] : vector<16x128xf32> to vector<128xf32>
    %58 = vector.shape_cast %57 : vector<128xf32> to vector<1x128xf32>
    %59 = arith.mulf %56, %58 : vector<1x128xf32>
    %cst_24 = arith.constant 0.999899983 : f32
    %60 = vector.broadcast %cst_24 : f32 to vector<1x128xf32>
    %61 = arith.cmpf oge, %59, %60 : vector<1x128xf32>
    %62 = arith.extui %61 : vector<1x128xi1> to vector<1x128xi32>
    %63 = arith.sitofp %62 : vector<1x128xi32> to vector<1x128xf32>
    %64 = vector.broadcast %63 : vector<1x128xf32> to vector<8x128xf32>
    %65 = arith.mulf %54, %64 : vector<8x128xf32>
    %c0_25 = arith.constant 0 : index
    %c0_26 = arith.constant 0 : index
    %c0_27 = arith.constant 0 : index
    %66 = vector.load %arg5[%c0_25, %c0_26, %c0_27] : memref<1x8x128xf32, #tpu.memory_space<vmem>>, vector<1x8x128xf32>
    %67 = vector.shape_cast %66 : vector<1x8x128xf32> to vector<8x128xf32>
    %68 = vector.shape_cast %65 : vector<8x128xf32> to vector<1x8x128xf32>
    tpu.vector_store %arg5[%c0_25, %c0_26, %c0_27], %68 {strides = array<i32>} : memref<1x8x128xf32, #tpu.memory_space<vmem>>, vector<1x8x128xf32>,
    return
  }
  func.func @transform_0(%arg0: i32, %arg1: i32) -> (i32, i32, i32) {
    %c0_i32 = arith.constant 0 : i32
    %c0_i32_0 = arith.constant 0 : i32
    %c0_i32_1 = arith.constant 0 : i32
    return %arg0, %c0_i32, %c0_i32_0 : i32, i32, i32
  }
  func.func @transform_1(%arg0: i32, %arg1: i32) -> (i32, i32, i32) {
    %c0_i32 = arith.constant 0 : i32
    %c0_i32_0 = arith.constant 0 : i32
    return %arg0, %c0_i32, %arg1 : i32, i32, i32
  }
  func.func @transform_2(%arg0: i32, %arg1: i32) -> (i32, i32) {
    %c0_i32 = arith.constant 0 : i32
    %c0_i32_0 = arith.constant 0 : i32
    return %c0_i32, %arg1 : i32, i32
  }
  func.func @transform_3(%arg0: i32, %arg1: i32) -> (i32, i32, i32) {
    %c0_i32 = arith.constant 0 : i32
    %c0_i32_0 = arith.constant 0 : i32
    return %arg0, %c0_i32, %arg1 : i32, i32, i32
  }
}

</mosaic_0001>

<bundles_post_ra>
// kernel: tpu_custom_call.1
= control target key start
LH: loop header
LB: loop body
LE: loop exit
PB: predicated region body
PF: predicated region fallthrough
CT: control target
= control target key end

     0   :  { %8 = vsyncpa [#allocation3], 0  ;;  %s1204_s0 = inlined_call_operand.vmem [shape: f32[2,128,16], index: 0, kind: input, shape index: {}]   ;;  %s1205_s1 = inlined_call_operand.vmem [shape: f32[2,2,256], index: 1, kind: input, shape index: {}]   ;;  %s1206_s2 = inlined_call_operand.vmem [shape: f32[2,256], index: 2, kind: input, shape index: {}]   ;;  %s1207_s3 = inlined_call_operand.hbm [shape: f32[2,8,256], index: 3, kind: output, shape index: {}]  }
   0x1   :  { %10 = vsyncpa [#allocation3 + $0x1], 0  ;;  %s998_s12 = smov 0   ;;  %s1000_s13 = smov 0  }
   0x2   :  { %s1002_s14 = smov 0   ;;  %s1004_s15 = smov 0  }
   0x3   :  { %s1006_s16 = smov 0   ;;  %s1008_s17 = smov 0  }
   0x4   :  { %s1010_s18 = smov 0   ;;  %s1012_s19 = smov 0  }
   0x5 LB: > { %s725_s20 = sadd.s32 4294967295, %s974_s19   ;;  %s726_s21 = sadd.s32 4294967294, %s974_s19   ;;  %s974_s19 = sphi %s1012_s19, %s16_s19   ;;  %s970_s18 = sphi %s1010_s18, %s1219_s18   ;;  %s966_s17 = sphi %s1008_s17, %s1218_s17   ;;  %s962_s16 = sphi %s1006_s16, %s1217_s16   ;;  %s958_s15 = sphi %s1004_s15, %s1216_s15   ;;  %s954_s14 = sphi %s1002_s14, %s1215_s14   ;;  %s950_s13 = sphi %s1000_s13, %s1214_s13   ;;  %s946_s12 = sphi %s998_s12, %s1213_s12  }
   0x6   : > { %s25_s22 = sadd.s32 1, %s966_s17  ;;  %s28_s23 = sadd.s32 1, %s970_s18 }
   0x7   : > { %p26_p0 = scmp.ge.s32.totalorder %s25_s22, 2  ;;  %p127_p1 = scmp.ne.s32.totalorder %s954_s14, %s950_s13 }
   0x8   : > { %p128_p2 = scmp.eq.s32.totalorder %s725_s20, 3  ;;  %p133_p5 = scmp.ne.s32.totalorder %s950_s13, %s946_s12 }
   0x9   : > { %s1221_s22 = smov (%p26_p0, %s25_s22), 0  ;;  %s1223_s23 = smov (!%p26_p0, %s28_s23), %s970_s18 }
   0xa   : > { %s113_s24 = ssub.s32 %s966_s17, %s1221_s22  ;;  %p1049_p3 = por %p128_p2, %p127_p1 }
   0xb   : > { %p30_p4 = scmp.ge.s32.totalorder %s1223_s23, 2  ;;  %p134_p6 = scmp.eq.s32.totalorder %s726_s21, 3 }
   0xc   : > { %p729_p7 = scmp.ge.s32.totalorder %s974_s19, 1  ;;  %p178_p9 = scmp.lt.s32.totalorder %s974_s19, 5 }
   0xd   : > { %s1225_s23 = smov (%p30_p4, %s1223_s23), 0  ;;  %p1058_p8 = por %p134_p6, %p133_p5 }
   0xe   : > { %1210 = sst [smem:[#allocation5_spill]] %s1225_s23  ;;  %s112_s27 = ssub.s32 %s970_s18, %s1225_s23 }
   0xf   : > { %s117_s28 = sadd.s32 1, %s954_s14  ;;  %s114_s29 = sor.u32 %s113_s24, %s112_s27 }
  0x10   : > { %p179_p10 = pnand %p729_p7, %p178_p9  ;;  %p115_p11 = scmp.eq.s32.totalorder %s114_s29, 0 }
  0x11   : > { %p214_p12 = scmp.lt.s32.totalorder (!%p179_p10), %s962_s16, 1  ;;  %p221_p13 = scmp.lt.s32.totalorder (!%p179_p10), %s958_s15, 1 }
  0x12   : > { %s1067_s30 = scalar_select %p115_p11, %s954_s14, %s117_s28  }
  0x13   : > { %182 = sbr.rel (%p179_p10) target bundleno = 304 (0x130), region = 32  ;;  %s211_s23 = sand.u32 (!%p179_p10), 1, %s950_s13  }
  0x14   : > { %s977_s24 = smov (!%p179_p10), [#allocation2]  }
  0x15   : > { %s886_s27 = sshll.u32 (!%p179_p10), %s977_s24, 4  ;;  %s887_s27 = int_to_ptr.vmem [resolvable:$false] %s886_s27 }
  0x18   : > { %s215_s4 = scalar_select %p214_p12, %s962_s16, 1  ;;  %vm284_vm0 = vcmask 130048   ;;  %v239_v2 = vlaneseq  ;;  %vm585_vm2 = vcmask 1041409   ;;  %vm588_vm3 = vcmask 1042434  }
  0x19   : > { %s222_s5 = scalar_select %p221_p13, %s958_s15, 1  ;;  %vm591_vm4 = vcmask 1043459   ;;  %vm594_vm5 = vcmask 1044484   ;;  %vm597_vm6 = vcmask 1045509   ;;  %vm600_vm7 = vcmask 1046534  }
  0x1a   : > { %s759_s6 = sshll.u32 %s215_s4, 7  ;;  %s733_s7 = sshll.u32 %s215_s4, 1  ;;  %v240_v7 = vshrl.u32 %v239_v2, 7  ;;  %vm603_vm8 = vcmask 1047559  }
  0x1b   : > { %s1076_s10 = scalar_lea.vmem %s1204_s0, %s759_s6  ;;  %s224_s11 = sadd.s32 %s733_s7, %s222_s5 }
  0x1c   : > { %s734_s20 = sshll.u32 %s224_s11, 1  ;;  %s735_s21 = sshll.u32 %s222_s5, 1  ;;  %v268_v0 = vld [vmem:[%s1076_s10] sm:$0xff]  ;;  %v241_v10 = vadd.s32 8, %v240_v7  ;;  %v246_v12 = vsub.s32 0, %v240_v7  ;;  %v258_v13 = vsub.s32 1, %v240_v7  ;;  %v242_v16 = vcvt.s32.f32 %v240_v7 }
  0x1d   : > { %v276_v1 = vld [vmem:[%s1076_s10 + $0x40] sm:$0xff]  ;;  %s226_s28 = scalar_lea.vmem %s1205_s1, %s734_s20  ;;  %s230_s4 = scalar_lea.vmem %s1206_s2, %s735_s21  ;;  %782 = vmatprep.mubr.msk.f32.mxu0 %vm284_vm0, %v268_v0  ;;  %v269_v30 = vld [vmem:[%s1076_s10 + $0x8] sm:$0xff]  ;;  %v270_v32 = vld [vmem:[%s1076_s10 + $0x10] sm:$0xff] }
  0x1e   : > { %794 = vmatprep.mubr.msk.f32.mxu1 %vm284_vm0, %v276_v1  ;;  %v231_v3 = vld [vmem:[%s230_s4] sm:$0x3]  ;;  %v243_v15 = vcvt.s32.f32 %v241_v10  ;;  %v277_v31 = vld [vmem:[%s1076_s10 + $0x48] sm:$0xff]  ;;  %v278_v33 = vld [vmem:[%s1076_s10 + $0x50] sm:$0xff]  ;;  %s730_s5 = sshll.u32 %s211_s23, 3  ;;  %s755_s6 = sshll.u32 %s962_s16, 1 }
  0x1f   : > { %v232_v4 = vld [vmem:[%s226_s28] sm:$0x3]  ;;  %v271_v34 = vld [vmem:[%s1076_s10 + $0x18] sm:$0xff]  ;;  %v273_v38 = vld [vmem:[%s1076_s10 + $0x28] sm:$0xff]  ;;  %s619_s7 = sadd.s32 %s958_s15, %s755_s6  ;;  %s213_s9 = scalar_lea.vmem [#allocation2], %s730_s5 }
  0x20   : > { %v233_v5 = vmul.f32 0.13333334, %v232_v4  ;;  %v279_v35 = vld [vmem:[%s1076_s10 + $0x58] sm:$0xff]  ;;  %v272_v36 = vld [vmem:[%s1076_s10 + $0x20] sm:$0xff]  ;;  %v281_v39 = vld [vmem:[%s1076_s10 + $0x68] sm:$0xff]  ;;  %s756_s8 = sshll.u32 %s619_s7, 7 }
  0x21   : > { %v280_v37 = vld [vmem:[%s1076_s10 + $0x60] sm:$0xff]  ;;  %v274_v40 = vld [vmem:[%s1076_s10 + $0x30] sm:$0xff]  ;;  %v275_v42 = vld [vmem:[%s1076_s10 + $0x38] sm:$0xff]  ;;  %s1156_s11 = scalar_lea.hbm %s1207_s3, %s756_s8  ;;  %s608_s20 = scalar_lea.sflag [#allocation3], %s211_s23 }
  0x22   : > { %v234_v6 = vadd.f32 %v233_v5, %v231_v3  ;;  %v282_v41 = vld [vmem:[%s1076_s10 + $0x70] sm:$0xff]  ;;  %v283_v43 = vld [vmem:[%s1076_s10 + $0x78] sm:$0xff]  ;;  %s623_s10 = sshll.u32 %s213_s9, 4  ;;  %s888_s28 = scalar_lea.vmem %s887_s27, 256  ;;  %s624_s10 = int_to_ptr.vmem [resolvable:$true] %s623_s10 }
  0x23   : > { %s882_s21 = scalar_lea.vmem %s624_s10, 128  ;;  %p889_p4 = scmp.lt.s32.totalorder %s624_s10, %s887_s27 }
  0x24   : > { %v235_v8 = vadd.f32 1.0, %v234_v6  ;;  %p883_p0 = scmp.ne.s32.totalorder %s624_s10, %s882_s21  ;;  %p890_p5 = scmp.lt.s32.totalorder %s888_s28, %s882_s21 }
  0x26   : > { %v236_v9 = vmul.f32 16.0, %v235_v8  ;;  %p884_p1 = pnand %p883_p0, %p1049_p3  ;;  %p891_p6 = por %p890_p5, %p889_p4 }
  0x28   : > { %v736_v11 = vadd.f32 -1.0, %v236_v9  ;;  %p885_p2 = pneg %p884_p1 }
  0x2a   : > { %v238_v14 = vmul.f32 0.5, %v736_v11  ;;  %p892_p7 = pnand %p891_p6, %p885_p2 }
  0x2c   : > { %v247_v17 = vrot.slane %v238_v14, %v246_v12  ;;  %v259_v18 = vrot.slane %v238_v14, %v258_v13 }
  0x2e   : > { %v249_v19 = vsub.f32 %v247_v17, %v243_v15  ;;  %v261_v20 = vsub.f32 %v259_v18, %v243_v15  ;;  %v248_v21 = vsub.f32 %v247_v17, %v242_v16  ;;  %v260_v22 = vsub.f32 %v259_v18, %v242_v16 }
  0x30   : > { %v251_v23 = vand.u32 2147483647, %v249_v19  ;;  %v250_v24 = vand.u32 2147483647, %v248_v21  ;;  %v263_v44 = vand.u32 2147483647, %v261_v20 }
  0x31   : > { %v262_v45 = vand.u32 2147483647, %v260_v22 }
  0x32   : > { %v253_v25 = vsub.f32 1.0, %v251_v23  ;;  %v252_v26 = vsub.f32 1.0, %v250_v24  ;;  %v265_v46 = vsub.f32 1.0, %v263_v44 }
  0x33   : > { %v264_v47 = vsub.f32 1.0, %v262_v45 }
  0x34   : > { %v255_v27 = vmax.f32 %v253_v25, 0.0  ;;  %v254_v28 = vmax.f32 %v252_v26, 0.0  ;;  %v1116_v49 = vmax.f32 %v265_v46, 0.0 }
  0x35   : > { %v1118_v50 = vmax.f32 %v264_v47, 0.0 }
  0x36   : > { %778 = vmatprep.subr.mxu0 %v255_v27  ;;  %806 = vmatprep.subr.mxu1 %v255_v27  ;;  %v550_v29 = vadd.f32 %v255_v27, %v254_v28 }
  0x37   : > { %779 = vmatpush3.msra.mxu0 %v255_v27  ;;  %808 = vmatpush3.msra.mxu1 %v255_v27  ;;  %v557_v53 = vadd.f32 %v1116_v49, %v1118_v50 }
  0x38   : > { %780 = vmatprep.subr.mxu0 %v254_v28  ;;  %807 = vmatprep.subr.mxu1 %v254_v28  ;;  %v551_v48 = vrot.slane %v550_v29, 4 }
  0x39   : > { %781 = vmatpush3.msra.mxu0 %v254_v28  ;;  %809 = vmatpush3.msra.mxu1 %v254_v28  ;;  %v558_v54 = vrot.slane %v557_v53, 4 }
  0x3a   : > { %783 = vmatmul.mubr.msk.f32.vlgmr.msra.gmra.mxu0 %vm284_vm0, %v269_v30  ;;  %795 = vmatmul.mubr.msk.f32.vlgmr.msra.gmra.mxu1 %vm284_vm0, %v277_v31  ;;  %v552_v51 = vadd.f32 %v551_v48, %v550_v29 }
  0x3b   : > { %785 = vmatprep.mubr.msk.f32.mxu0 %vm284_vm0, %v270_v32  ;;  %797 = vmatprep.mubr.msk.f32.mxu1 %vm284_vm0, %v278_v33  ;;  %v559_v56 = vadd.f32 %v558_v54, %v557_v53  ;;  %v976_v33 = vmov 0.0  }
  0x3c   : > { %v553_v52 = vrot.slane %v552_v51, 2 }
  0x3d   : > { %v560_v57 = vrot.slane %v559_v56, 2 }
  0x3e   : > { %786 = vmatmul.mubr.msk.f32.gmra.mxu0 %vm284_vm0, %v271_v34  ;;  %798 = vmatmul.mubr.msk.f32.gmra.mxu1 %vm284_vm0, %v279_v35  ;;  %v554_v55 = vadd.f32 %v553_v52, %v552_v51 }
  0x3f   : > { %788 = vmatprep.mubr.msk.f32.mxu0 %vm284_vm0, %v272_v36  ;;  %800 = vmatprep.mubr.msk.f32.mxu1 %vm284_vm0, %v280_v37  ;;  %v561_v59 = vadd.f32 %v560_v57, %v559_v56 }
  0x40   : > { %v555_v58 = vrot.slane %v554_v55, 1 }
  0x41   : > { %v562_v60 = vrot.slane %v561_v59, 1 }
  0x42   : > { %789 = vmatmul.mubr.msk.f32.gmra.mxu0 %vm284_vm0, %v273_v38  ;;  %801 = vmatmul.mubr.msk.f32.gmra.mxu1 %vm284_vm0, %v281_v39  ;;  %v556_v61 = vadd.f32 %v555_v58, %v554_v55 }
  0x43   : > { %791 = vmatprep.mubr.msk.f32.mxu0 %vm284_vm0, %v274_v40  ;;  %803 = vmatprep.mubr.msk.f32.mxu1 %vm284_vm0, %v282_v41  ;;  %v563_v62 = vadd.f32 %v562_v60, %v561_v59 }
  0x45   : > { %v564_v63 = vmul.f32 %v563_v62, %v556_v61 }
  0x46   : > { %792 = vmatmul.mubr.msk.f32.gmra.mxu0 %vm284_vm0, %v275_v42  ;;  %804 = vmatmul.mubr.msk.f32.gmra.mxu1 %vm284_vm0, %v283_v43 }
  0x47   : > { %vm565_vm1 = vcmp.ge.f32.partialorder %v564_v63, 0.9999 }
  0x48   : > { %v1131_v34 = vsel %vm565_vm1, 1.0, %v976_v33 }
  0xfa   : > { %v784_v0 = vpop.f32.mrf.mxu0  ;;  %v796_v1 = vpop.f32.mrf.mxu1 }
  0xfb   : > { %v487_v2 = vmul.f32 %v796_v1, %v1116_v49  ;;  %v479_v5 = vmul.f32 %v784_v0, %v1116_v49 }
  0xfc   : > { %v399_v3 = vpop.f32.mrf.mxu0  ;;  %v439_v4 = vpop.f32.mrf.mxu1 }
  0xfd   : > { %v478_v6 = vmul.f32 %v399_v3, %v1118_v50  ;;  %v486_v7 = vmul.f32 %v439_v4, %v1118_v50 }
  0xfe   : > { %v787_v8 = vpop.f32.mrf.mxu0  ;;  %v799_v9 = vpop.f32.mrf.mxu1 }
  0xff   : > { %v494_v10 = vadd.f32 %v479_v5, %v478_v6  ;;  %v522_v11 = vadd.f32 %v487_v2, %v486_v7  ;;  %v489_v12 = vmul.f32 %v799_v9, %v1116_v49  ;;  %v481_v13 = vmul.f32 %v787_v8, %v1116_v49 }
 0x100   : > { %v409_v14 = vpop.f32.mrf.mxu0  ;;  %v449_v15 = vpop.f32.mrf.mxu1 }
 0x101   : > { %v495_v16 = vrot.slane %v494_v10, 4  ;;  %v523_v17 = vrot.slane %v522_v11, 4  ;;  %v480_v18 = vmul.f32 %v409_v14, %v1118_v50  ;;  %v488_v19 = vmul.f32 %v449_v15, %v1118_v50 }
 0x102   : > { %v790_v20 = vpop.f32.mrf.mxu0  ;;  %v802_v21 = vpop.f32.mrf.mxu1 }
 0x103   : > { %v496_v22 = vadd.f32 %v495_v16, %v494_v10  ;;  %v524_v23 = vadd.f32 %v523_v17, %v522_v11  ;;  %v501_v24 = vadd.f32 %v481_v13, %v480_v18  ;;  %v529_v25 = vadd.f32 %v489_v12, %v488_v19 }
 0x104   : > { %v491_v26 = vmul.f32 %v802_v21, %v1116_v49  ;;  %v419_v27 = vpop.f32.mrf.mxu0  ;;  %v459_v28 = vpop.f32.mrf.mxu1  ;;  %v483_v35 = vmul.f32 %v790_v20, %v1116_v49 }
 0x105   : > { %v497_v29 = vrot.slane %v496_v22, 2  ;;  %v525_v30 = vrot.slane %v524_v23, 2  ;;  %v502_v31 = vrot.slane %v501_v24, 4  ;;  %v530_v32 = vrot.slane %v529_v25, 4 }
 0x106   : > { %v482_v36 = vmul.f32 %v419_v27, %v1118_v50  ;;  %v490_v37 = vmul.f32 %v459_v28, %v1118_v50  ;;  %v793_v38 = vpop.f32.mrf.mxu0  ;;  %v805_v39 = vpop.f32.mrf.mxu1 }
 0x107   : > { %v498_v40 = vadd.f32 %v497_v29, %v496_v22  ;;  %v526_v41 = vadd.f32 %v525_v30, %v524_v23  ;;  %v503_v42 = vadd.f32 %v502_v31, %v501_v24  ;;  %v531_v43 = vadd.f32 %v530_v32, %v529_v25 }
 0x108   : > { %v508_v44 = vadd.f32 %v483_v35, %v482_v36  ;;  %v536_v45 = vadd.f32 %v491_v26, %v490_v37  ;;  %v485_v46 = vmul.f32 %v793_v38, %v1116_v49  ;;  %v493_v47 = vmul.f32 %v805_v39, %v1116_v49  ;;  %v429_v48 = vpop.f32.mrf.mxu0  ;;  %v469_v51 = vpop.f32.mrf.mxu1 }
 0x109   : > { %v499_v52 = vrot.slane %v498_v40, 1  ;;  %v527_v53 = vrot.slane %v526_v41, 1  ;;  %v504_v54 = vrot.slane %v503_v42, 2  ;;  %v532_v55 = vrot.slane %v531_v43, 2 }
 0x10a   : > { %v509_v56 = vrot.slane %v508_v44, 4  ;;  %v537_v57 = vrot.slane %v536_v45, 4  ;;  %v484_v58 = vmul.f32 %v429_v48, %v1118_v50  ;;  %v492_v59 = vmul.f32 %v469_v51, %v1118_v50 }
 0x10b   : > { %v500_v60 = vadd.f32 %v499_v52, %v498_v40  ;;  %v528_v61 = vadd.f32 %v527_v53, %v526_v41  ;;  %v505_v62 = vadd.f32 %v504_v54, %v503_v42  ;;  %v533_v63 = vadd.f32 %v532_v55, %v531_v43 }
 0x10c   : > { %v510_v0 = vadd.f32 %v509_v56, %v508_v44  ;;  %v538_v1 = vadd.f32 %v537_v57, %v536_v45  ;;  %v515_v2 = vadd.f32 %v485_v46, %v484_v58  ;;  %v543_v49 = vadd.f32 %v493_v47, %v492_v59 }
 0x10d   : > { %v568_v3 = vmul.f32 %v1131_v34, %v500_v60  ;;  %v572_v4 = vmul.f32 %v1131_v34, %v528_v61  ;;  %v506_v5 = vrot.slane %v505_v62, 1  ;;  %v534_v6 = vrot.slane %v533_v63, 1 }
 0x10e   : > { %v511_v7 = vrot.slane %v510_v0, 2  ;;  %v539_v8 = vrot.slane %v538_v1, 2  ;;  %v516_v9 = vrot.slane %v515_v2, 4  ;;  %v544_v10 = vrot.slane %v543_v49, 4 }
 0x10f   : > { %v507_v11 = vadd.f32 %v506_v5, %v505_v62  ;;  %v535_v50 = vadd.f32 %v534_v6, %v533_v63  ;;  %v593_v40 = vrot.slane %v572_v4, 4 }
 0x110   : > { %v512_v12 = vadd.f32 %v511_v7, %v510_v0  ;;  %v540_v13 = vadd.f32 %v539_v8, %v538_v1  ;;  %v517_v14 = vadd.f32 %v516_v9, %v515_v2  ;;  %v545_v15 = vadd.f32 %v544_v10, %v543_v49 }
 0x111   : > { %v569_v16 = vmul.f32 %v1131_v34, %v507_v11  ;;  %v573_v17 = vmul.f32 %v1131_v34, %v535_v50 }
 0x112   : > { %v513_v18 = vrot.slane %v512_v12, 1  ;;  %v541_v19 = vrot.slane %v540_v13, 1  ;;  %v518_v20 = vrot.slane %v517_v14, 2  ;;  %v546_v21 = vrot.slane %v545_v15, 2 }
 0x113   : > { %v584_v22 = vrot.slane %v569_v16, 7  ;;  %v596_v41 = vrot.slane %v573_v17, 3 }
 0x114   : > { %v514_v23 = vadd.f32 %v513_v18, %v512_v12  ;;  %v542_v24 = vadd.f32 %v541_v19, %v540_v13  ;;  %v519_v25 = vadd.f32 %v518_v20, %v517_v14  ;;  %v547_v26 = vadd.f32 %v546_v21, %v545_v15 }
 0x115   : > { %v586_v27 = vsel %vm585_vm2, %v584_v22, %v568_v3 }
 0x116   : > { %v570_v28 = vmul.f32 %v1131_v34, %v514_v23  ;;  %v574_v29 = vmul.f32 %v1131_v34, %v542_v24  ;;  %v520_v30 = vrot.slane %v519_v25, 1  ;;  %v548_v31 = vrot.slane %v547_v26, 1 }
 0x118   : > { %v587_v32 = vrot.slane %v570_v28, 6  ;;  %v521_v33 = vadd.f32 %v520_v30, %v519_v25  ;;  %v549_v35 = vadd.f32 %v548_v31, %v547_v26  ;;  %v599_v43 = vrot.slane %v574_v29, 2 }
 0x11a   : > { %v589_v36 = vsel %vm588_vm3, %v587_v32, %v586_v27  ;;  %v571_v37 = vmul.f32 %v1131_v34, %v521_v33  ;;  %v575_v38 = vmul.f32 %v1131_v34, %v549_v35 }
 0x11c   : > { %v590_v39 = vrot.slane %v571_v37, 5  ;;  %v602_v46 = vrot.slane %v575_v38, 1 }
 0x11e   : > { %v592_v42 = vsel %vm591_vm4, %v590_v39, %v589_v36 }
 0x11f   : > { %v595_v44 = vsel %vm594_vm5, %v593_v40, %v592_v42 }
 0x120   : > { %v598_v45 = vsel %vm597_vm6, %v596_v41, %v595_v44 }
 0x121   : > { %v601_v34 = vsel %vm600_vm7, %v599_v43, %v598_v45 }
 0x122   : > { %v604_v47 = vsel %vm603_vm8, %v602_v46, %v601_v34 }
 0x123   : > { %606 = vst [vmem:[%s213_s9] sm:$0xff] %v604_v47 }
 0x124   : > { %895 = shalt.err (!%p892_p7)
}
 0x125   : > { %s896_s29 = scalar_lea.hbm %s1156_s11, 128  ;;  %s900_s5 = scalar_lea.hbm %s1207_s3, 512 }
 0x126   : > { %p897_p9 = scmp.ne.s32.totalorder %s1156_s11, %s896_s29  ;;  %p901_p12 = scmp.lt.s32.totalorder %s1156_s11, %s1207_s3 }
 0x127   : > { %p902_p13 = scmp.lt.s32.totalorder %s900_s5, %s896_s29 }
 0x128   : > { %p898_p10 = pnand %p897_p9, %p1049_p3 }
 0x129   : > { %p903_p0 = por %p902_p13, %p901_p12 }
 0x12a   : > { %p899_p11 = pneg %p898_p10 }
 0x12c   : > { %p904_p1 = pnand %p903_p0, %p899_p11 }
 0x12e   : > { %907 = shalt.err (!%p904_p1)
}
 0x12f   : > { %810 = dma.vmem_to_hbm [thread:$0]  (%p1049_p3), %s624_s10, 128, %s1156_s11, %s608_s20  }
 0x130 PF: > { %p816_p2 = scmp.ge.s32.totalorder %s974_s19, 2  ;;  %s635_s8 = sand.u32 1, %s946_s12  }
 0x131   : > { %s636_s9 = scalar_lea.sflag [#allocation3], %s635_s8 }
 0x132   : > { %p813_p4 = pnand %p816_p2, %p1058_p8 }
 0x134   : > { %p814_p5 = pneg %p813_p4 }
 0x136   : > { %941 = dma.done.wait (%p814_p5), %s636_s9, 128  }
 0x137   : > { %943 = vsyncadd (%p814_p5), %s636_s9, 4294967168  ;;  %s16_s19 = sadd.s32 1, %s974_s19   ;;  %s1212_s25 = sld [smem:[#allocation5_spill]] }
 0x138   : > { %p13_p6 = scmp.ge.s32.totalorder %s16_s19, 6   ;;  %s1213_s12 = smov %s950_s13 }
 0x139   : > { %s1214_s13 = smov %s954_s14  ;;  %s1215_s14 = smov %s1067_s30 }
 0x13a   : > { %s1216_s15 = smov %s966_s17  ;;  %s1217_s16 = smov %s970_s18 }
 0x13b   : > { %s1218_s17 = smov %s1221_s22  ;;  %15 = sbr.rel (!%p13_p6) target bundleno = 5 (0x5), region = 73 }
 0x13d   : > { %s1219_s18 = smov %s1212_s25 }
 0x140   :  { %641 = vsyncpa [#allocation3], 1 }
 0x141   :  { %643 = vsyncpa [#allocation3 + $0x1], 1 }

</bundles_post_ra>
